<compile_context>
chip_gen: v5e
topology: v5e:2x2
jax: 0.10.0
libtpu: 0.0.40
codegen_flags: <defaults>
</compile_context>

<pallas_src>
import jax
import jax.numpy as jnp
from jax.experimental import pallas as pl
from jax.experimental.pallas import tpu as pltpu

LN_EPS = 1e-5  # nn.LayerNorm default


def _prenorm_linear_kernel(x_ref, gb_ref, w_ref, wb_ref, o_ref, y_ref):
    # x_ref : (TM, D)  tile of tokens
    # gb_ref: (2, D)   row 0 = LN gamma, row 1 = LN beta
    # w_ref : (D, TN)  Linear weight tile (stored as (in, out))
    # wb_ref: (1, TN)  Linear bias tile
    # o_ref : (TM, TN)
    # y_ref : (TM, D)  VMEM scratch holding LayerNorm(x) in the matmul dtype
    j = pl.program_id(1)

    @pl.when(j == 0)
    def _():
        # LayerNorm over the last dim, f32 stats (biased variance, like
        # torch.nn.LayerNorm). Only done once per row tile; reused for all
        # output-column tiles.
        x = x_ref[...].astype(jnp.float32)
        mean = jnp.mean(x, axis=-1, keepdims=True)
        xc = x - mean
        var = jnp.mean(xc * xc, axis=-1, keepdims=True)
        inv = jax.lax.rsqrt(var + LN_EPS)
        gamma = gb_ref[0:1, :].astype(jnp.float32)
        beta = gb_ref[1:2, :].astype(jnp.float32)
        y = xc * inv * gamma + beta
        y_ref[...] = y.astype(y_ref.dtype)

    # fn(norm(x)) : Linear(dim, dim). MXU in the weight's native dtype
    # (bf16 fast path when weights are bf16); accumulate in f32.
    out = jnp.dot(y_ref[...], w_ref[...], preferred_element_type=jnp.float32)
    out = out + wb_ref[...].astype(jnp.float32)
    o_ref[...] = out.astype(o_ref.dtype)


def _round_up(x, m):
    return (x + m - 1) // m * m


def prenorm(x, gamma, beta, w, wb, *, row_tile=256, col_tile=512):
    """y = Linear(LayerNorm(x)).  x: (B, S, D) -> (B, S, D_out)."""
    B, S, D = x.shape
    d_in, d_out = w.shape
    assert d_in == D
    rows = B * S

    # Sublane packing: 8 rows for 4-byte dtypes, 16 for 2-byte dtypes.
    sub = 16 if x.dtype.itemsize == 2 else 8
    tm = max(sub, min(_round_up(row_tile, sub), _round_up(rows, sub)))
    rows_p = _round_up(rows, tm)

    # Tile the output (N) dimension only when it divides evenly (col_tile is a
    # multiple of 128 so stores stay lane-dense); bounds W's VMEM footprint
    # for large D (v7x has only 64 MiB VMEM per TensorCore).
    tn = col_tile if (d_out > col_tile and d_out % col_tile == 0) else d_out

    x2 = x.reshape(rows, D)
    if rows_p != rows:
        x2 = jnp.pad(x2, ((0, rows_p - rows), (0, 0)))
    gb = jnp.stack([gamma, beta]).reshape(2, D)
    wb2 = wb.reshape(1, d_out)

    grid = (rows_p // tm, d_out // tn)

    # Scoped VMEM budget: double-buffered x/out tiles + W/bias tiles + params
    # + LN scratch, with headroom, clamped so the request is valid everywhere.
    bpe_x = x.dtype.itemsize
    bpe_w = w.dtype.itemsize
    need = (2 * tm * D * bpe_x          # x tile (double-buffered)
            + 2 * tm * tn * bpe_x       # out tile (double-buffered)
            + 2 * D * tn * bpe_w        # W tile (double-buffered)
            + 2 * (2 * D + tn) * bpe_w  # gamma/beta + linear bias
            + tm * D * bpe_w)           # LN scratch
    vmem_limit = int(min(64 << 20, max(32 << 20, int(need * 1.3) + (4 << 20))))

    cost = pl.CostEstimate(
        flops=2 * rows * D * d_out,
        transcendentals=rows,
        bytes_accessed=(rows * D + rows * d_out) * bpe_x + D * d_out * bpe_w,
    )

    out2 = pl.pallas_call(
        _prenorm_linear_kernel,
        out_shape=jax.ShapeDtypeStruct((rows_p, d_out), x.dtype),
        grid_spec=pltpu.PrefetchScalarGridSpec(
            num_scalar_prefetch=0,
            grid=grid,
            in_specs=[
                pl.BlockSpec((tm, D), lambda i, j: (i, 0)),   # x tile
                pl.BlockSpec((2, D), lambda i, j: (0, 0)),    # gamma / beta
                pl.BlockSpec((D, tn), lambda i, j: (0, j)),   # W tile (in, out)
                pl.BlockSpec((1, tn), lambda i, j: (0, j)),   # linear bias tile
            ],
            out_specs=pl.BlockSpec((tm, tn), lambda i, j: (i, j)),
            scratch_shapes=[pltpu.VMEM((tm, D), w.dtype)],    # cached LN(x)
        ),
        compiler_params=pltpu.CompilerParams(
            # N axis is "arbitrary": the LN scratch is filled at j == 0 and
            # reused for j > 0, so all j for a given i must run on one core.
            dimension_semantics=("parallel", "arbitrary"),
            vmem_limit_bytes=vmem_limit,
        ),
        cost_estimate=cost,
    )(x2, gb, w, wb2)

    if rows_p != rows:
        out2 = out2[:rows]
    return out2.reshape(B, S, d_out)


def prenorm_ref(x, gamma, beta, w, wb):
    xf = x.astype(jnp.float32)
    mean = jnp.mean(xf, axis=-1, keepdims=True)
    var = jnp.mean((xf - mean) ** 2, axis=-1, keepdims=True)
    y = ((xf - mean) * jax.lax.rsqrt(var + LN_EPS) * gamma.astype(jnp.float32)
         + beta.astype(jnp.float32))
    out = y @ w.astype(jnp.float32) + wb.astype(jnp.float32)
    return out.astype(x.dtype)


if __name__ == "__main__":
    B, S, D = 2, 8, 128  # lane-dense D (multiple of 128)
    key = jax.random.PRNGKey(0)
    kx, kg, kb, kw, kwb = jax.random.split(key, 5)

    x = jax.random.normal(kx, (B, S, D), dtype=jnp.float32)
    gamma = jnp.ones((D,), jnp.float32) + 0.1 * jax.random.normal(kg, (D,), jnp.float32)
    beta = 0.1 * jax.random.normal(kb, (D,), jnp.float32)
    w = jax.random.normal(kw, (D, D), jnp.float32) * (1.0 / jnp.sqrt(D))
    wb = 0.1 * jax.random.normal(kwb, (D,), jnp.float32)

    # f32 path (exercises row padding/clamping: rows=16 << row_tile default).
    out = jax.block_until_ready(prenorm(x, gamma, beta, w, wb))
    ref = prenorm_ref(x, gamma, beta, w, wb)
    assert out.shape == (B, S, D)
    assert jnp.allclose(out, ref, atol=1e-4, rtol=1e-4), "f32 mismatch vs reference"

    # bf16 mixed-precision path: LN stats stay f32, matmul runs bf16 on the MXU.
    out_bf = jax.block_until_ready(
        prenorm(x.astype(jnp.bfloat16),
                gamma.astype(jnp.bfloat16), beta.astype(jnp.bfloat16),
                w.astype(jnp.bfloat16), wb.astype(jnp.bfloat16)))
    assert out_bf.shape == (B, S, D)
    assert jnp.allclose(out_bf.astype(jnp.float32), ref.astype(jnp.float32),
                        atol=0.1, rtol=0.1), "bf16 mismatch vs reference"

    # Exercise the N-tiled path (d_out > col_tile) to make sure the LN-scratch
    # reuse across j tiles is correct.
    D2 = 128
    Dout2 = 1024
    kx2, kw2, kwb2 = jax.random.split(kx, 3)
    x2 = jax.random.normal(kx2, (B, S, D2), dtype=jnp.float32)
    w2 = jax.random.normal(kw2, (D2, Dout2), jnp.float32) * (1.0 / jnp.sqrt(D2))
    wb2 = 0.1 * jax.random.normal(kwb2, (Dout2,), jnp.float32)
    g2 = jnp.ones((D2,), jnp.float32)
    b2 = jnp.zeros((D2,), jnp.float32)
    out2 = jax.block_until_ready(prenorm(x2, g2, b2, w2, wb2))
    ref2 = prenorm_ref(x2, g2, b2, w2, wb2)
    assert out2.shape == (B, S, Dout2)
    assert jnp.allclose(out2, ref2, atol=1e-3, rtol=1e-3), "N-tiled mismatch vs reference"

    print("KERNEL_OK")
</pallas_src>

<mosaic_0001>
module attributes {stable_mosaic.version = 11 : i64} {
  func.func @_prenorm_linear_kernel(%arg0: i32, %arg1: i32, %arg2: memref<16x128xf32, #tpu.memory_space<vmem>>, %arg3: memref<2x128xf32, #tpu.memory_space<vmem>>, %arg4: memref<128x128xf32, #tpu.memory_space<vmem>>, %arg5: memref<1x128xf32, #tpu.memory_space<vmem>>, %arg6: memref<16x128xf32, #tpu.memory_space<vmem>>, %arg7: memref<16x128xf32, #tpu.memory_space<vmem>>) attributes {dimension_semantics = [#tpu.dimension_semantics<parallel>, #tpu.dimension_semantics<arbitrary>], iteration_bounds = array<i64: 1, 1>, scalar_prefetch = 0 : i64, scratch_operands = 1 : i64, tpu.core_type = #tpu.core_type<tc>, window_params = [{transform_indices = @transform_0, window_bounds = array<i64: 16, 128>}, {pipeline_mode = #tpu.pipeline_mode<synchronous>, transform_indices = @transform_1, window_bounds = array<i64: 2, 128>}, {transform_indices = @transform_2, window_bounds = array<i64: 128, 128>}, {transform_indices = @transform_3, window_bounds = array<i64: 1, 128>}, {transform_indices = @transform_4, window_bounds = array<i64: 16, 128>}]} {
    %c0_i32 = arith.constant 0 : i32
    %0 = arith.cmpi eq, %arg1, %c0_i32 : i32
    %1 = arith.extui %0 : i1 to i32
    %c0_i32_0 = arith.constant 0 : i32
    %2 = arith.cmpi ne, %1, %c0_i32_0 : i32
    scf.if %2 {
      %c0_8 = arith.constant 0 : index
      %c0_9 = arith.constant 0 : index
      %10 = vector.load %arg2[%c0_8, %c0_9] : memref<16x128xf32, #tpu.memory_space<vmem>>, vector<16x128xf32>
      %cst_10 = arith.constant dense<0.000000e+00> : vector<16xf32>
      %11 = vector.multi_reduction <add>, %10, %cst_10 [1] : vector<16x128xf32> to vector<16xf32>
      %12 = vector.shape_cast %11 : vector<16xf32> to vector<16x1xf32>
      %cst_11 = arith.constant 1.280000e+02 : f32
      %13 = vector.broadcast %cst_11 : f32 to vector<16x1xf32>
      %14 = arith.divf %12, %13 : vector<16x1xf32>
      %15 = vector.broadcast %14 : vector<16x1xf32> to vector<16x128xf32>
      %16 = arith.subf %10, %15 : vector<16x128xf32>
      %17 = arith.mulf %16, %16 : vector<16x128xf32>
      %cst_12 = arith.constant dense<0.000000e+00> : vector<16xf32>
      %18 = vector.multi_reduction <add>, %17, %cst_12 [1] : vector<16x128xf32> to vector<16xf32>
      %19 = vector.shape_cast %18 : vector<16xf32> to vector<16x1xf32>
      %cst_13 = arith.constant 1.280000e+02 : f32
      %20 = vector.broadcast %cst_13 : f32 to vector<16x1xf32>
      %21 = arith.divf %19, %20 : vector<16x1xf32>
      %cst_14 = arith.constant 9.99999974E-6 : f32
      %22 = vector.broadcast %cst_14 : f32 to vector<16x1xf32>
      %23 = arith.addf %21, %22 : vector<16x1xf32>
      %24 = math.rsqrt %23 : vector<16x1xf32>
      %c0_15 = arith.constant 0 : index
      %c0_16 = arith.constant 0 : index
      %25 = vector.load %arg3[%c0_15, %c0_16] : memref<2x128xf32, #tpu.memory_space<vmem>>, vector<1x128xf32>
      %c1 = arith.constant 1 : index
      %c0_17 = arith.constant 0 : index
      %26 = vector.load %arg3[%c1, %c0_17] : memref<2x128xf32, #tpu.memory_space<vmem>>, vector<1x128xf32>
      %27 = vector.broadcast %24 : vector<16x1xf32> to vector<16x128xf32>
      %28 = arith.mulf %16, %27 : vector<16x128xf32>
      %29 = vector.broadcast %25 : vector<1x128xf32> to vector<16x128xf32>
      %30 = arith.mulf %28, %29 : vector<16x128xf32>
      %31 = vector.broadcast %26 : vector<1x128xf32> to vector<16x128xf32>
      %32 = arith.addf %30, %31 : vector<16x128xf32>
      %c0_18 = arith.constant 0 : index
      %c0_19 = arith.constant 0 : index
      %33 = vector.load %arg7[%c0_18, %c0_19] : memref<16x128xf32, #tpu.memory_space<vmem>>, vector<16x128xf32>
      tpu.vector_store %arg7[%c0_18, %c0_19], %32 {strides = array<i32>} : memref<16x128xf32, #tpu.memory_space<vmem>>, vector<16x128xf32>,
    } else {
    }
    %c0 = arith.constant 0 : index
    %c0_1 = arith.constant 0 : index
    %3 = vector.load %arg7[%c0, %c0_1] : memref<16x128xf32, #tpu.memory_space<vmem>>, vector<16x128xf32>
    %c0_2 = arith.constant 0 : index
    %c0_3 = arith.constant 0 : index
    %4 = vector.load %arg4[%c0_2, %c0_3] : memref<128x128xf32, #tpu.memory_space<vmem>>, vector<128x128xf32>
    %cst = arith.constant dense<0.000000e+00> : vector<16x128xf32>
    %5 = tpu.matmul %3, %4, %cst {dimension_numbers = #tpu.dot_dimension_numbers<[1], [0], [0], [1], [0, 0, 1, 1], [], []>} : vector<16x128xf32>, vector<128x128xf32>, vector<16x128xf32> -> vector<16x128xf32>
    %c0_4 = arith.constant 0 : index
    %c0_5 = arith.constant 0 : index
    %6 = vector.load %arg5[%c0_4, %c0_5] : memref<1x128xf32, #tpu.memory_space<vmem>>, vector<1x128xf32>
    %7 = vector.broadcast %6 : vector<1x128xf32> to vector<16x128xf32>
    %8 = arith.addf %5, %7 : vector<16x128xf32>
    %c0_6 = arith.constant 0 : index
    %c0_7 = arith.constant 0 : index
    %9 = vector.load %arg6[%c0_6, %c0_7] : memref<16x128xf32, #tpu.memory_space<vmem>>, vector<16x128xf32>
    tpu.vector_store %arg6[%c0_6, %c0_7], %8 {strides = array<i32>} : memref<16x128xf32, #tpu.memory_space<vmem>>, vector<16x128xf32>,
    return
  }
  func.func @transform_0(%arg0: i32, %arg1: i32) -> (i32, i32) {
    %c0_i32 = arith.constant 0 : i32
    %c0_i32_0 = arith.constant 0 : i32
    return %arg0, %c0_i32 : i32, i32
  }
  func.func @transform_1(%arg0: i32, %arg1: i32) -> (i32, i32) {
    %c0_i32 = arith.constant 0 : i32
    %c0_i32_0 = arith.constant 0 : i32
    %c0_i32_1 = arith.constant 0 : i32
    return %c0_i32, %c0_i32_0 : i32, i32
  }
  func.func @transform_2(%arg0: i32, %arg1: i32) -> (i32, i32) {
    %c0_i32 = arith.constant 0 : i32
    %c0_i32_0 = arith.constant 0 : i32
    return %c0_i32, %arg1 : i32, i32
  }
  func.func @transform_3(%arg0: i32, %arg1: i32) -> (i32, i32) {
    %c0_i32 = arith.constant 0 : i32
    %c0_i32_0 = arith.constant 0 : i32
    return %c0_i32, %arg1 : i32, i32
  }
  func.func @transform_4(%arg0: i32, %arg1: i32) -> (i32, i32) {
    %c0_i32 = arith.constant 0 : i32
    return %arg0, %arg1 : i32, i32
  }
}

</mosaic_0001>

<bundles_post_ra>
// kernel: tpu_custom_call.1
= control target key start
LH: loop header
LB: loop body
LE: loop exit
PB: predicated region body
PF: predicated region fallthrough
CT: control target
= control target key end

     0   :  { %9 = vsyncpa [#allocation4], 0  ;;  %s393_s0 = inlined_call_operand.hbm [shape: f32[16,128], index: 0, kind: input, shape index: {}]   ;;  %s394_s1 = inlined_call_operand.hbm [shape: f32[2,128], index: 1, kind: input, shape index: {}]   ;;  %s395_s2 = inlined_call_operand.hbm [shape: f32[128,128], index: 2, kind: input, shape index: {}]   ;;  %s396_s3 = inlined_call_operand.vmem [shape: f32[1,128], index: 3, kind: input, shape index: {}]   ;;  %s397_s4 = inlined_call_operand.hbm [shape: f32[16,128], index: 4, kind: output, shape index: {}]  }
   0x1   :  { %10 = vsyncpa [#allocation7], 0  ;;  %s30_s17 = sshll.u32 %s394_s1, 4  ;;  %s31_s17 = int_to_ptr.hbm [resolvable:$true] %s30_s17 }
   0x2   :  { %11 = vsyncpa [#allocation5], 0  ;;  %s327_s18 = smov [#allocation6]   ;;  %s16_s22 = sshll.u32 %s393_s0, 4  ;;  %s17_s22 = int_to_ptr.hbm [resolvable:$true] %s16_s22 }
   0x3   :  { %s32_s19 = sshll.u32 %s327_s18, 4  ;;  %s328_s23 = smov [#allocation3]   ;;  %s33_s19 = int_to_ptr.vmem [resolvable:$true] %s32_s19 }
   0x4   :  { %35 = dma.hbm_to_vmem [thread:$0]  %s31_s17, 32, %s33_s19, [#allocation7]  }
   0x5   :  { %s18_s24 = sshll.u32 %s328_s23, 4  ;;  %s329_s25 = smov 128   ;;  %s19_s24 = int_to_ptr.vmem [resolvable:$true] %s18_s24 }
   0x6   :  { %s330_s26 = smov 8   ;;  %s40_s28 = sshll.u32 %s395_s2, 4  ;;  %s41_s28 = int_to_ptr.hbm [resolvable:$true] %s40_s28 }
   0x7   :  { %24 = dma.hbm_to_vmem [thread:$0]  %s17_s22, 256, %s19_s24, [#allocation4], %s329_s25, %s329_s25, %s330_s26  }
   0x8   :  { %s331_s29 = smov [#allocation8]  }
   0x9   :  { %s42_s30 = sshll.u32 %s331_s29, 4  ;;  %s43_s30 = int_to_ptr.vmem [resolvable:$true] %s42_s30 }
   0xa   :  { %48 = dma.hbm_to_vmem [thread:$0]  %s41_s28, 2048, %s43_s30, [#allocation7], %s329_s25, %s329_s25, %s330_s26  }
   0xb   :  { %321 = dma.done.wait [#allocation4], 256  }
   0xc   :  { %322 = vsyncadd [#allocation4], 4294967040 }
   0xd   :  { %323 = dma.done.wait [#allocation7], 2080  }
   0xe   :  { %324 = vsyncadd [#allocation7], 4294965216  ;;  %v67_v0 = vld [vmem:[#allocation3] sm:$0xff]  ;;  %v68_v1 = vld [vmem:[#allocation3 + $0x8] sm:$0xff]  ;;  %v332_v2 = vmov 128.0   ;;  %s333_s5 = smov [#allocation9]  }
   0xf   :  { %69 = vadd.xlane.f32.xlu0 %v67_v0  ;;  %219 = vrcp.f32 %v332_v2  ;;  %v143_v5 = vld [vmem:[#allocation8 + $0x78] sm:$0xff]  ;;  %v142_v6 = vld [vmem:[#allocation8 + $0x70] sm:$0xff]  ;;  %v141_v19 = vld [vmem:[#allocation8 + $0x68] sm:$0xff]  ;;  %s177_s6 = sshll.u32 %s333_s5, 4  ;;  %s179_s9 = sshll.u32 %s397_s4, 4  ;;  %s178_s6 = int_to_ptr.vmem [resolvable:$true] %s177_s6  ;;  %s180_s9 = int_to_ptr.hbm [resolvable:$true] %s179_s9 }
  0x10   :  { %148 = vmatpush.msra.mxu0 %v143_v5  ;;  %193 = vmatpush.msra.mxu1 %v143_v5  ;;  %v140_v20 = vld [vmem:[#allocation8 + $0x60] sm:$0xff]  ;;  %v139_v21 = vld [vmem:[#allocation8 + $0x58] sm:$0xff]  ;;  %v138_v22 = vld [vmem:[#allocation8 + $0x50] sm:$0xff] }
  0x11   :  { %v137_v23 = vld [vmem:[#allocation8 + $0x48] sm:$0xff]  ;;  %v136_v24 = vld [vmem:[#allocation8 + $0x40] sm:$0xff]  ;;  %v135_v25 = vld [vmem:[#allocation8 + $0x38] sm:$0xff] }
  0x12   :  { %149 = vmatpush.msra.mxu0 %v142_v6  ;;  %194 = vmatpush.msra.mxu1 %v142_v6  ;;  %v134_v26 = vld [vmem:[#allocation8 + $0x30] sm:$0xff]  ;;  %v133_v27 = vld [vmem:[#allocation8 + $0x28] sm:$0xff]  ;;  %v132_v28 = vld [vmem:[#allocation8 + $0x20] sm:$0xff] }
  0x13   :  { %v131_v29 = vld [vmem:[#allocation8 + $0x18] sm:$0xff]  ;;  %v130_v30 = vld [vmem:[#allocation8 + $0x10] sm:$0xff]  ;;  %v129_v31 = vld [vmem:[#allocation8 + $0x8] sm:$0xff] }
  0x14   :  { %150 = vmatpush.msra.mxu0 %v141_v19  ;;  %195 = vmatpush.msra.mxu1 %v141_v19  ;;  %v128_v32 = vld [vmem:[#allocation8] sm:$0xff]  ;;  %v216_v47 = vld [vmem:[#allocation6] ss:$0 sm:$0xff]  ;;  %v217_v51 = vld [vmem:[#allocation6 + $0x1] ss:$0 sm:$0xff] }
  0x15   :  { %v220_v3 = vpop.eup %219  ;;  %v218_v61 = vld [vmem:[%s396_s3] ss:$0 sm:$0xff] }
  0x16   :  { %v74_v4 = vmul.f32 128.0, %v220_v3  ;;  %vm78_vm0 = vweird.f32 %v220_v3  ;;  %151 = vmatpush.msra.mxu0 %v140_v20  ;;  %196 = vmatpush.msra.mxu1 %v140_v20 }
  0x17   :  { %71 = vadd.xlane.f32.xlu0 %v68_v1 }
  0x18   :  { %v75_v7 = vsub.f32 1.0, %v74_v4  ;;  %152 = vmatpush.msra.mxu0 %v139_v21  ;;  %197 = vmatpush.msra.mxu1 %v139_v21 }
  0x1a   :  { %v76_v8 = vmul.f32 %v220_v3, %v75_v7  ;;  %153 = vmatpush.msra.mxu0 %v138_v22  ;;  %198 = vmatpush.msra.mxu1 %v138_v22 }
  0x1c   :  { %v77_v9 = vadd.f32 %v220_v3, %v76_v8  ;;  %154 = vmatpush.msra.mxu0 %v137_v23  ;;  %199 = vmatpush.msra.mxu1 %v137_v23 }
  0x1e   :  { %v79_v10 = vsel %vm78_vm0, %v220_v3, %v77_v9  ;;  %155 = vmatpush.msra.mxu0 %v136_v24  ;;  %200 = vmatpush.msra.mxu1 %v136_v24 }
  0x20   :  { %156 = vmatpush.msra.mxu0 %v135_v25  ;;  %201 = vmatpush.msra.mxu1 %v135_v25 }
  0x22   :  { %157 = vmatpush.msra.mxu0 %v134_v26  ;;  %202 = vmatpush.msra.mxu1 %v134_v26 }
  0x24   :  { %158 = vmatpush.msra.mxu0 %v133_v27  ;;  %203 = vmatpush.msra.mxu1 %v133_v27 }
  0x26   :  { %159 = vmatpush.msra.mxu0 %v132_v28  ;;  %204 = vmatpush.msra.mxu1 %v132_v28 }
  0x28   :  { %160 = vmatpush.msra.mxu0 %v131_v29  ;;  %205 = vmatpush.msra.mxu1 %v131_v29 }
  0x2a   :  { %161 = vmatpush.msra.mxu0 %v130_v30  ;;  %206 = vmatpush.msra.mxu1 %v130_v30 }
  0x2c   :  { %162 = vmatpush.msra.mxu0 %v129_v31  ;;  %207 = vmatpush.msra.mxu1 %v129_v31 }
  0x2e   :  { %163 = vmatpush.msra.mxu0 %v128_v32  ;;  %208 = vmatpush.msra.mxu1 %v128_v32 }
  0x82   :  { %v70_v11 = vpop.xlane.xlu0 %69 }
  0x83   :  { %v80_v12 = vmul.f32 %v79_v10, %v70_v11 }
  0x85   :  { %v374_v13 = vsub.f32 %v67_v0, %v80_v12 }
  0x87   :  { %v84_v14 = vmul.f32 %v374_v13, %v374_v13 }
  0x89   :  { %86 = vadd.xlane.f32.xlu1 %v84_v14 }
  0x8a   :  { %v72_v15 = vpop.xlane.xlu0 %71 }
  0x8b   :  { %v81_v16 = vmul.f32 %v79_v10, %v72_v15 }
  0x8d   :  { %v378_v17 = vsub.f32 %v68_v1, %v81_v16 }
  0x8f   :  { %v85_v18 = vmul.f32 %v378_v17, %v378_v17 }
  0x91   :  { %88 = vadd.xlane.f32.xlu1 %v85_v18 }
  0xfc   :  { %v87_v33 = vpop.xlane.xlu1 %86 }
  0xfd   :  { %v90_v34 = vmul.f32 %v87_v33, %v79_v10 }
  0xff   :  { %v92_v35 = vadd.f32 1e-05, %v90_v34 }
 0x101   :  { %221 = vrsqrt.f32 %v92_v35  ;;  %vm100_vm2 = vweird.f32 %v92_v35 }
 0x104   :  { %v89_v36 = vpop.xlane.xlu1 %88 }
 0x105   :  { %v91_v37 = vmul.f32 %v89_v36, %v79_v10 }
 0x107   :  { %v222_v38 = vpop.eup %221  ;;  %v93_v39 = vadd.f32 1e-05, %v91_v37 }
 0x108   :  { %v95_v40 = vmul.f32 %v222_v38, %v92_v35  ;;  %vm101_vm1 = vweird.f32 %v222_v38 }
 0x109   :  { %223 = vrsqrt.f32 %v93_v39  ;;  %vm102_vm3 = vmor %vm100_vm2, %vm101_vm1  ;;  %vm110_vm5 = vweird.f32 %v93_v39 }
 0x10a   :  { %v96_v41 = vmul.f32 %v222_v38, %v95_v40 }
 0x10c   :  { %v97_v42 = vmul.f32 0.5, %v96_v41 }
 0x10e   :  { %v98_v43 = vsub.f32 1.5, %v97_v42 }
 0x10f   :  { %v224_v44 = vpop.eup %223 }
 0x110   :  { %v99_v45 = vmul.f32 %v222_v38, %v98_v43  ;;  %v105_v46 = vmul.f32 %v224_v44, %v93_v39  ;;  %vm111_vm4 = vweird.f32 %v224_v44 }
 0x111   :  { %vm112_vm6 = vmor %vm110_vm5, %vm111_vm4 }
 0x112   :  { %v106_v48 = vmul.f32 %v224_v44, %v105_v46  ;;  %v103_v49 = vsel %vm102_vm3, %v222_v38, %v99_v45 }
 0x113   :  { %v116_v50 = vmul.f32 %v103_v49, %v374_v13 }
 0x114   :  { %v107_v52 = vmul.f32 0.5, %v106_v48 }
 0x115   :  { %v119_v53 = vmul.f32 %v216_v47, %v116_v50 }
 0x116   :  { %v108_v54 = vsub.f32 1.5, %v107_v52 }
 0x117   :  { %v122_v55 = vadd.f32 %v217_v51, %v119_v53 }
 0x118   :  { %v109_v56 = vmul.f32 %v224_v44, %v108_v54 }
 0x119   :  { %164 = vmatmul.f32.vlgmr.msra.gmra.mxu0 %v122_v55 }
 0x11a   :  { %v113_v57 = vsel %vm112_vm6, %v224_v44, %v109_v56 }
 0x11b   :  { %v117_v58 = vmul.f32 %v113_v57, %v378_v17 }
 0x11d   :  { %v120_v59 = vmul.f32 %v216_v47, %v117_v58 }
 0x11f   :  { %v123_v60 = vadd.f32 %v217_v51, %v120_v59 }
 0x121   :  { %167 = vmatmul.f32.vlgmr.msra.gmra.mxu1 %v123_v60 }
 0x196   :  { %v165_v62 = vpop.f32.mrf.mxu0 }
 0x197   :  { %v166_v63 = vadd.f32 %v218_v61, %v165_v62 }
 0x199   :  { %171 = vst [vmem:[#allocation9] sm:$0xff] %v166_v63 }
 0x19e   :  { %v168_v0 = vpop.f32.mrf.mxu1 }
 0x19f   :  { %v169_v1 = vadd.f32 %v218_v61, %v168_v0 }
 0x1a1   :  { %172 = vst [vmem:[#allocation9 + $0x8] sm:$0xff] %v169_v1 }
 0x1a2   :  { %185 = dma.vmem_to_hbm [thread:$0]  %s178_s6, 256, %s180_s9, [#allocation5], %s329_s25, %s329_s25, %s330_s26  }
 0x1a3   :  { %325 = dma.done.wait [#allocation5], 256  }
 0x1a4   :  { %326 = vsyncadd [#allocation5], 4294967040 }
 0x1a5   :  { %190 = vsyncpa [#allocation4], 1 }
 0x1a6   :  { %191 = vsyncpa [#allocation7], 1 }
 0x1a7   :  { %192 = vsyncpa [#allocation5], 1 }

</bundles_post_ra>
